<compile_context>
chip_gen: v7x
topology: tpu7x:2x2x1
jax: 0.10.0
libtpu: 0.0.40
codegen_flags: <defaults>
</compile_context>

<pallas_src>
import jax
import jax.numpy as jnp
from jax.experimental import pallas as pl
from jax.experimental.pallas import tpu as pltpu


# ---------------------------------------------------------------------------
# Kernel bodies
# ---------------------------------------------------------------------------

def _make_resident_kernel(rows_per_step: int, quant: bool):
    """Embedding table is VMEM-resident; rows are selected with dynamic
    first-axis indexing of the resident block (no per-row HBM DMA)."""
    if quant:
        def kernel(ids_ref, w_ref, scaler_ref, out_ref):
            base = pl.program_id(0) * rows_per_step
            for r in range(rows_per_step):
                idx = ids_ref[base + r]
                row = w_ref[idx].astype(jnp.float32) * scaler_ref[idx]
                out_ref[r, :] = row.astype(out_ref.dtype)
    else:
        def kernel(ids_ref, w_ref, out_ref):
            base = pl.program_id(0) * rows_per_step
            for r in range(rows_per_step):
                out_ref[r, :] = w_ref[ids_ref[base + r]].astype(out_ref.dtype)
    return kernel


def _make_gather_kernel(rows_per_step: int, quant: bool):
    """R scalar-prefetch-driven HBM row-gather streams per grid step; the
    per-row scale (quant) comes from the SMEM-resident scaler."""
    if quant:
        def kernel(ids_ref, *refs):
            row_refs = refs[:rows_per_step]
            scaler_ref = refs[rows_per_step]
            out_ref = refs[rows_per_step + 1]
            base = pl.program_id(0) * rows_per_step
            for r in range(rows_per_step):
                s = scaler_ref[ids_ref[base + r]]
                row = row_refs[r][0, 0, :].astype(jnp.float32) * s
                out_ref[r, :] = row.astype(out_ref.dtype)
    else:
        def kernel(ids_ref, *refs):
            row_refs = refs[:rows_per_step]
            out_ref = refs[rows_per_step]
            for r in range(rows_per_step):
                out_ref[r, :] = row_refs[r][0, 0, :].astype(out_ref.dtype)
    return kernel


# ---------------------------------------------------------------------------
# Wrapper
# ---------------------------------------------------------------------------

def embedding_forward(x, weight, weight_scaler=None):
    """Pallas equivalent of Embedding.forward.

    x:              integer indices, any shape
    weight:         (V, D) float table, or int8 when weight_scaler is given
    weight_scaler:  optional (V,) float32 per-row scale (quant=True path)
    returns:        x.shape + (D,); weight dtype (non-quant) or float32 (quant)
    """
    V, D = weight.shape
    quant = weight_scaler is not None
    out_dtype = jnp.float32 if quant else weight.dtype

    # Clamp ids so a bad id can never drive an out-of-bounds row DMA.
    ids = jnp.clip(x.reshape(-1).astype(jnp.int32), 0, V - 1)
    n_tokens = int(ids.shape[0])

    # Per-core VMEM budget (v7x: 64 MiB, v5e/v6e: 128 MiB).
    try:
        vmem_cap = int(pltpu.get_tpu_info().vmem_capacity_bytes)
    except Exception:
        vmem_cap = 64 * 1024 * 1024  # v7x-safe default
    table_bytes = int(V) * int(D) * weight.dtype.itemsize
    # Resident fast path only for 32-bit tables for now.
    # TODO(synk): extend the resident path to bf16/int8 tables once packed-
    # dtype dynamic row indexing is validated; int8 quant tables currently
    # take the batched-gather path.
    resident_ok = (weight.dtype.itemsize >= 4
                   and table_bytes <= int(0.45 * vmem_cap))

    # Rows per grid step: multiple of the sublane group for the output dtype
    # so the (rows, D) output block stores unmasked and writes back densely.
    # The resident path takes bigger steps (no per-row HBM streams); the
    # gather path is capped at 16 independent row streams.
    sub = 16 if jnp.dtype(out_dtype).itemsize <= 2 else 8
    n_sub_pad = pl.cdiv(n_tokens, sub) * sub
    rows = min(64 if resident_ok else 16, n_sub_pad)

    n_blocks = pl.cdiv(n_tokens, rows)
    n_pad = n_blocks * rows
    if n_pad != n_tokens:
        ids = jnp.concatenate(
            [ids, jnp.zeros((n_pad - n_tokens,), jnp.int32)])

    out_shape = jax.ShapeDtypeStruct((n_pad, D), out_dtype)
    out_spec = pl.BlockSpec((rows, D), lambda i, ids_ref: (i, 0))
    smem_spec = pl.BlockSpec(memory_space=pltpu.MemorySpace.SMEM)

    if resident_ok:
        # Whole table DMA'd once into VMEM (constant index_map), rows picked
        # inside the kernel from the resident block.
        kernel = _make_resident_kernel(rows, quant)
        in_specs = [pl.BlockSpec((V, D), lambda i, ids_ref: (0, 0))]
        operands = [weight]
        if quant:
            in_specs.append(smem_spec)
            operands.append(weight_scaler.astype(jnp.float32))
        compiler_params = pltpu.CompilerParams(
            dimension_semantics=("parallel",),
            vmem_limit_bytes=min(int(0.9 * vmem_cap),
                                 table_bytes + (16 << 20)),
        )
    else:
        # Batched gather: R row streams per step, each (1,1,D) block selected
        # by the scalar-prefetched ids inside the index_map; 3-deep buffering
        # keeps several scattered row DMAs in flight.
        kernel = _make_gather_kernel(rows, quant)
        w3 = weight.reshape(V, 1, D)
        in_specs = [
            pl.BlockSpec((1, 1, D),
                         lambda i, ids_ref, r=r: (ids_ref[i * rows + r], 0, 0),
                         pipeline_mode=pl.Buffered(3))
            for r in range(rows)
        ]
        operands = [w3] * rows
        if quant:
            # Whole (V,) scaler staged once in SMEM; indexed per token in-kernel.
            # TODO(synk): for very large vocabularies stage the scaler in VMEM
            # (or gather it per-row) instead of SMEM.
            in_specs.append(smem_spec)
            operands.append(weight_scaler.astype(jnp.float32))
        compiler_params = pltpu.CompilerParams(
            dimension_semantics=("parallel",))

    out = pl.pallas_call(
        kernel,
        out_shape=out_shape,
        grid_spec=pltpu.PrefetchScalarGridSpec(
            num_scalar_prefetch=1,     # token ids -> SMEM, fed to index_maps
            grid=(n_blocks,),          # `rows` gathered rows per grid step
            in_specs=in_specs,
            out_specs=out_spec,
        ),
        compiler_params=compiler_params,
    )(ids, *operands)

    return out[:n_tokens].reshape(x.shape + (D,))


# ---------------------------------------------------------------------------
# Demo / self-test
# ---------------------------------------------------------------------------

if __name__ == "__main__":
    key = jax.random.PRNGKey(0)
    k_w, k_s, k_x = jax.random.split(key, 3)

    num_embeddings, embedding_dim = 64, 128
    batch, seq = 2, 8

    x = jax.random.randint(k_x, (batch, seq), 0, num_embeddings,
                           dtype=jnp.int32)

    # --- quant=False, f32 table -> VMEM-resident fast path ------------------
    weight = jax.random.normal(k_w, (num_embeddings, embedding_dim),
                               dtype=jnp.float32)
    out = jax.block_until_ready(embedding_forward(x, weight))
    ref = weight[x]
    assert out.shape == (batch, seq, embedding_dim), out.shape
    assert out.dtype == weight.dtype, out.dtype
    assert jnp.allclose(out, ref), "quant=False (f32) mismatch"

    # --- quant=False, bf16 table -> batched gather path ---------------------
    weight_bf16 = weight.astype(jnp.bfloat16)
    x_odd = jax.random.randint(k_s, (3, 5), 0, num_embeddings,
                               dtype=jnp.int32)   # 15 tokens -> padding path
    out_b = jax.block_until_ready(embedding_forward(x_odd, weight_bf16))
    ref_b = weight_bf16[x_odd]
    assert out_b.shape == (3, 5, embedding_dim), out_b.shape
    assert out_b.dtype == jnp.bfloat16, out_b.dtype
    assert jnp.array_equal(out_b, ref_b), "quant=False (bf16) mismatch"

    # --- quant=True path (int8 table + scaler -> batched gather path) -------
    w_q = jax.random.randint(k_w, (num_embeddings, embedding_dim),
                             -128, 128, dtype=jnp.int32).astype(jnp.int8)
    scaler = jax.random.uniform(k_s, (num_embeddings,),
                                minval=0.5, maxval=1.5, dtype=jnp.float32)
    out_q = jax.block_until_ready(embedding_forward(x, w_q, scaler))
    ref_q = (w_q.astype(jnp.float32) * scaler[:, None])[x]
    assert out_q.shape == (batch, seq, embedding_dim), out_q.shape
    assert out_q.dtype == jnp.float32, out_q.dtype
    assert jnp.allclose(out_q, ref_q), "quant=True mismatch"

    print("KERNEL_OK")
</pallas_src>

<mosaic_0001>
module attributes {stable_mosaic.version = 11 : i64} {
  func.func @kernel(%arg0: i32, %arg1: memref<16xi32, #tpu.memory_space<smem>>, %arg2: memref<64x128xf32, #tpu.memory_space<vmem>>, %arg3: memref<16x128xf32, #tpu.memory_space<vmem>>) attributes {dimension_semantics = [#tpu.dimension_semantics<parallel>], iteration_bounds = array<i64: 1>, scalar_prefetch = 1 : i64, scratch_operands = 0 : i64, tpu.core_type = #tpu.core_type<tc>, window_params = [{pipeline_mode = #tpu.pipeline_mode<synchronous>, transform_indices = @transform_0, window_bounds = array<i64: 64, 128>}, {transform_indices = @transform_1, window_bounds = array<i64: 16, 128>}]} {
    %c16_i32 = arith.constant 16 : i32
    %0 = arith.muli %arg0, %c16_i32 : i32
    %c0_i32 = arith.constant 0 : i32
    %1 = arith.addi %0, %c0_i32 : i32
    %2 = arith.index_cast %1 : i32 to index
    %3 = memref.load %arg1[%2] : memref<16xi32, #tpu.memory_space<smem>>
    %4 = arith.index_cast %3 : i32 to index
    %c0 = arith.constant 0 : index
    %5 = vector.load %arg2[%4, %c0] : memref<64x128xf32, #tpu.memory_space<vmem>>, vector<1x128xf32>
    %6 = vector.shape_cast %5 : vector<1x128xf32> to vector<128xf32>
    %c0_0 = arith.constant 0 : index
    %c0_1 = arith.constant 0 : index
    %7 = vector.load %arg3[%c0_0, %c0_1] : memref<16x128xf32, #tpu.memory_space<vmem>>, vector<1x128xf32>
    %8 = vector.shape_cast %7 : vector<1x128xf32> to vector<128xf32>
    %9 = vector.shape_cast %6 : vector<128xf32> to vector<1x128xf32>
    tpu.vector_store %arg3[%c0_0, %c0_1], %9 {strides = array<i32>} : memref<16x128xf32, #tpu.memory_space<vmem>>, vector<1x128xf32>,
    %c1_i32 = arith.constant 1 : i32
    %10 = arith.addi %0, %c1_i32 : i32
    %11 = arith.index_cast %10 : i32 to index
    %12 = memref.load %arg1[%11] : memref<16xi32, #tpu.memory_space<smem>>
    %13 = arith.index_cast %12 : i32 to index
    %c0_2 = arith.constant 0 : index
    %14 = vector.load %arg2[%13, %c0_2] : memref<64x128xf32, #tpu.memory_space<vmem>>, vector<1x128xf32>
    %15 = vector.shape_cast %14 : vector<1x128xf32> to vector<128xf32>
    %c1 = arith.constant 1 : index
    %c0_3 = arith.constant 0 : index
    %16 = vector.load %arg3[%c1, %c0_3] : memref<16x128xf32, #tpu.memory_space<vmem>>, vector<1x128xf32>
    %17 = vector.shape_cast %16 : vector<1x128xf32> to vector<128xf32>
    %18 = vector.shape_cast %15 : vector<128xf32> to vector<1x128xf32>
    tpu.vector_store %arg3[%c1, %c0_3], %18 {strides = array<i32>} : memref<16x128xf32, #tpu.memory_space<vmem>>, vector<1x128xf32>,
    %c2_i32 = arith.constant 2 : i32
    %19 = arith.addi %0, %c2_i32 : i32
    %20 = arith.index_cast %19 : i32 to index
    %21 = memref.load %arg1[%20] : memref<16xi32, #tpu.memory_space<smem>>
    %22 = arith.index_cast %21 : i32 to index
    %c0_4 = arith.constant 0 : index
    %23 = vector.load %arg2[%22, %c0_4] : memref<64x128xf32, #tpu.memory_space<vmem>>, vector<1x128xf32>
    %24 = vector.shape_cast %23 : vector<1x128xf32> to vector<128xf32>
    %c2 = arith.constant 2 : index
    %c0_5 = arith.constant 0 : index
    %25 = vector.load %arg3[%c2, %c0_5] : memref<16x128xf32, #tpu.memory_space<vmem>>, vector<1x128xf32>
    %26 = vector.shape_cast %25 : vector<1x128xf32> to vector<128xf32>
    %27 = vector.shape_cast %24 : vector<128xf32> to vector<1x128xf32>
    tpu.vector_store %arg3[%c2, %c0_5], %27 {strides = array<i32>} : memref<16x128xf32, #tpu.memory_space<vmem>>, vector<1x128xf32>,
    %c3_i32 = arith.constant 3 : i32
    %28 = arith.addi %0, %c3_i32 : i32
    %29 = arith.index_cast %28 : i32 to index
    %30 = memref.load %arg1[%29] : memref<16xi32, #tpu.memory_space<smem>>
    %31 = arith.index_cast %30 : i32 to index
    %c0_6 = arith.constant 0 : index
    %32 = vector.load %arg2[%31, %c0_6] : memref<64x128xf32, #tpu.memory_space<vmem>>, vector<1x128xf32>
    %33 = vector.shape_cast %32 : vector<1x128xf32> to vector<128xf32>
    %c3 = arith.constant 3 : index
    %c0_7 = arith.constant 0 : index
    %34 = vector.load %arg3[%c3, %c0_7] : memref<16x128xf32, #tpu.memory_space<vmem>>, vector<1x128xf32>
    %35 = vector.shape_cast %34 : vector<1x128xf32> to vector<128xf32>
    %36 = vector.shape_cast %33 : vector<128xf32> to vector<1x128xf32>
    tpu.vector_store %arg3[%c3, %c0_7], %36 {strides = array<i32>} : memref<16x128xf32, #tpu.memory_space<vmem>>, vector<1x128xf32>,
    %c4_i32 = arith.constant 4 : i32
    %37 = arith.addi %0, %c4_i32 : i32
    %38 = arith.index_cast %37 : i32 to index
    %39 = memref.load %arg1[%38] : memref<16xi32, #tpu.memory_space<smem>>
    %40 = arith.index_cast %39 : i32 to index
    %c0_8 = arith.constant 0 : index
    %41 = vector.load %arg2[%40, %c0_8] : memref<64x128xf32, #tpu.memory_space<vmem>>, vector<1x128xf32>
    %42 = vector.shape_cast %41 : vector<1x128xf32> to vector<128xf32>
    %c4 = arith.constant 4 : index
    %c0_9 = arith.constant 0 : index
    %43 = vector.load %arg3[%c4, %c0_9] : memref<16x128xf32, #tpu.memory_space<vmem>>, vector<1x128xf32>
    %44 = vector.shape_cast %43 : vector<1x128xf32> to vector<128xf32>
    %45 = vector.shape_cast %42 : vector<128xf32> to vector<1x128xf32>
    tpu.vector_store %arg3[%c4, %c0_9], %45 {strides = array<i32>} : memref<16x128xf32, #tpu.memory_space<vmem>>, vector<1x128xf32>,
    %c5_i32 = arith.constant 5 : i32
    %46 = arith.addi %0, %c5_i32 : i32
    %47 = arith.index_cast %46 : i32 to index
    %48 = memref.load %arg1[%47] : memref<16xi32, #tpu.memory_space<smem>>
    %49 = arith.index_cast %48 : i32 to index
    %c0_10 = arith.constant 0 : index
    %50 = vector.load %arg2[%49, %c0_10] : memref<64x128xf32, #tpu.memory_space<vmem>>, vector<1x128xf32>
    %51 = vector.shape_cast %50 : vector<1x128xf32> to vector<128xf32>
    %c5 = arith.constant 5 : index
    %c0_11 = arith.constant 0 : index
    %52 = vector.load %arg3[%c5, %c0_11] : memref<16x128xf32, #tpu.memory_space<vmem>>, vector<1x128xf32>
    %53 = vector.shape_cast %52 : vector<1x128xf32> to vector<128xf32>
    %54 = vector.shape_cast %51 : vector<128xf32> to vector<1x128xf32>
    tpu.vector_store %arg3[%c5, %c0_11], %54 {strides = array<i32>} : memref<16x128xf32, #tpu.memory_space<vmem>>, vector<1x128xf32>,
    %c6_i32 = arith.constant 6 : i32
    %55 = arith.addi %0, %c6_i32 : i32
    %56 = arith.index_cast %55 : i32 to index
    %57 = memref.load %arg1[%56] : memref<16xi32, #tpu.memory_space<smem>>
    %58 = arith.index_cast %57 : i32 to index
    %c0_12 = arith.constant 0 : index
    %59 = vector.load %arg2[%58, %c0_12] : memref<64x128xf32, #tpu.memory_space<vmem>>, vector<1x128xf32>
    %60 = vector.shape_cast %59 : vector<1x128xf32> to vector<128xf32>
    %c6 = arith.constant 6 : index
    %c0_13 = arith.constant 0 : index
    %61 = vector.load %arg3[%c6, %c0_13] : memref<16x128xf32, #tpu.memory_space<vmem>>, vector<1x128xf32>
    %62 = vector.shape_cast %61 : vector<1x128xf32> to vector<128xf32>
    %63 = vector.shape_cast %60 : vector<128xf32> to vector<1x128xf32>
    tpu.vector_store %arg3[%c6, %c0_13], %63 {strides = array<i32>} : memref<16x128xf32, #tpu.memory_space<vmem>>, vector<1x128xf32>,
    %c7_i32 = arith.constant 7 : i32
    %64 = arith.addi %0, %c7_i32 : i32
    %65 = arith.index_cast %64 : i32 to index
    %66 = memref.load %arg1[%65] : memref<16xi32, #tpu.memory_space<smem>>
    %67 = arith.index_cast %66 : i32 to index
    %c0_14 = arith.constant 0 : index
    %68 = vector.load %arg2[%67, %c0_14] : memref<64x128xf32, #tpu.memory_space<vmem>>, vector<1x128xf32>
    %69 = vector.shape_cast %68 : vector<1x128xf32> to vector<128xf32>
    %c7 = arith.constant 7 : index
    %c0_15 = arith.constant 0 : index
    %70 = vector.load %arg3[%c7, %c0_15] : memref<16x128xf32, #tpu.memory_space<vmem>>, vector<1x128xf32>
    %71 = vector.shape_cast %70 : vector<1x128xf32> to vector<128xf32>
    %72 = vector.shape_cast %69 : vector<128xf32> to vector<1x128xf32>
    tpu.vector_store %arg3[%c7, %c0_15], %72 {strides = array<i32>} : memref<16x128xf32, #tpu.memory_space<vmem>>, vector<1x128xf32>,
    %c8_i32 = arith.constant 8 : i32
    %73 = arith.addi %0, %c8_i32 : i32
    %74 = arith.index_cast %73 : i32 to index
    %75 = memref.load %arg1[%74] : memref<16xi32, #tpu.memory_space<smem>>
    %76 = arith.index_cast %75 : i32 to index
    %c0_16 = arith.constant 0 : index
    %77 = vector.load %arg2[%76, %c0_16] : memref<64x128xf32, #tpu.memory_space<vmem>>, vector<1x128xf32>
    %78 = vector.shape_cast %77 : vector<1x128xf32> to vector<128xf32>
    %c8 = arith.constant 8 : index
    %c0_17 = arith.constant 0 : index
    %79 = vector.load %arg3[%c8, %c0_17] : memref<16x128xf32, #tpu.memory_space<vmem>>, vector<1x128xf32>
    %80 = vector.shape_cast %79 : vector<1x128xf32> to vector<128xf32>
    %81 = vector.shape_cast %78 : vector<128xf32> to vector<1x128xf32>
    tpu.vector_store %arg3[%c8, %c0_17], %81 {strides = array<i32>} : memref<16x128xf32, #tpu.memory_space<vmem>>, vector<1x128xf32>,
    %c9_i32 = arith.constant 9 : i32
    %82 = arith.addi %0, %c9_i32 : i32
    %83 = arith.index_cast %82 : i32 to index
    %84 = memref.load %arg1[%83] : memref<16xi32, #tpu.memory_space<smem>>
    %85 = arith.index_cast %84 : i32 to index
    %c0_18 = arith.constant 0 : index
    %86 = vector.load %arg2[%85, %c0_18] : memref<64x128xf32, #tpu.memory_space<vmem>>, vector<1x128xf32>
    %87 = vector.shape_cast %86 : vector<1x128xf32> to vector<128xf32>
    %c9 = arith.constant 9 : index
    %c0_19 = arith.constant 0 : index
    %88 = vector.load %arg3[%c9, %c0_19] : memref<16x128xf32, #tpu.memory_space<vmem>>, vector<1x128xf32>
    %89 = vector.shape_cast %88 : vector<1x128xf32> to vector<128xf32>
    %90 = vector.shape_cast %87 : vector<128xf32> to vector<1x128xf32>
    tpu.vector_store %arg3[%c9, %c0_19], %90 {strides = array<i32>} : memref<16x128xf32, #tpu.memory_space<vmem>>, vector<1x128xf32>,
    %c10_i32 = arith.constant 10 : i32
    %91 = arith.addi %0, %c10_i32 : i32
    %92 = arith.index_cast %91 : i32 to index
    %93 = memref.load %arg1[%92] : memref<16xi32, #tpu.memory_space<smem>>
    %94 = arith.index_cast %93 : i32 to index
    %c0_20 = arith.constant 0 : index
    %95 = vector.load %arg2[%94, %c0_20] : memref<64x128xf32, #tpu.memory_space<vmem>>, vector<1x128xf32>
    %96 = vector.shape_cast %95 : vector<1x128xf32> to vector<128xf32>
    %c10 = arith.constant 10 : index
    %c0_21 = arith.constant 0 : index
    %97 = vector.load %arg3[%c10, %c0_21] : memref<16x128xf32, #tpu.memory_space<vmem>>, vector<1x128xf32>
    %98 = vector.shape_cast %97 : vector<1x128xf32> to vector<128xf32>
    %99 = vector.shape_cast %96 : vector<128xf32> to vector<1x128xf32>
    tpu.vector_store %arg3[%c10, %c0_21], %99 {strides = array<i32>} : memref<16x128xf32, #tpu.memory_space<vmem>>, vector<1x128xf32>,
    %c11_i32 = arith.constant 11 : i32
    %100 = arith.addi %0, %c11_i32 : i32
    %101 = arith.index_cast %100 : i32 to index
    %102 = memref.load %arg1[%101] : memref<16xi32, #tpu.memory_space<smem>>
    %103 = arith.index_cast %102 : i32 to index
    %c0_22 = arith.constant 0 : index
    %104 = vector.load %arg2[%103, %c0_22] : memref<64x128xf32, #tpu.memory_space<vmem>>, vector<1x128xf32>
    %105 = vector.shape_cast %104 : vector<1x128xf32> to vector<128xf32>
    %c11 = arith.constant 11 : index
    %c0_23 = arith.constant 0 : index
    %106 = vector.load %arg3[%c11, %c0_23] : memref<16x128xf32, #tpu.memory_space<vmem>>, vector<1x128xf32>
    %107 = vector.shape_cast %106 : vector<1x128xf32> to vector<128xf32>
    %108 = vector.shape_cast %105 : vector<128xf32> to vector<1x128xf32>
    tpu.vector_store %arg3[%c11, %c0_23], %108 {strides = array<i32>} : memref<16x128xf32, #tpu.memory_space<vmem>>, vector<1x128xf32>,
    %c12_i32 = arith.constant 12 : i32
    %109 = arith.addi %0, %c12_i32 : i32
    %110 = arith.index_cast %109 : i32 to index
    %111 = memref.load %arg1[%110] : memref<16xi32, #tpu.memory_space<smem>>
    %112 = arith.index_cast %111 : i32 to index
    %c0_24 = arith.constant 0 : index
    %113 = vector.load %arg2[%112, %c0_24] : memref<64x128xf32, #tpu.memory_space<vmem>>, vector<1x128xf32>
    %114 = vector.shape_cast %113 : vector<1x128xf32> to vector<128xf32>
    %c12 = arith.constant 12 : index
    %c0_25 = arith.constant 0 : index
    %115 = vector.load %arg3[%c12, %c0_25] : memref<16x128xf32, #tpu.memory_space<vmem>>, vector<1x128xf32>
    %116 = vector.shape_cast %115 : vector<1x128xf32> to vector<128xf32>
    %117 = vector.shape_cast %114 : vector<128xf32> to vector<1x128xf32>
    tpu.vector_store %arg3[%c12, %c0_25], %117 {strides = array<i32>} : memref<16x128xf32, #tpu.memory_space<vmem>>, vector<1x128xf32>,
    %c13_i32 = arith.constant 13 : i32
    %118 = arith.addi %0, %c13_i32 : i32
    %119 = arith.index_cast %118 : i32 to index
    %120 = memref.load %arg1[%119] : memref<16xi32, #tpu.memory_space<smem>>
    %121 = arith.index_cast %120 : i32 to index
    %c0_26 = arith.constant 0 : index
    %122 = vector.load %arg2[%121, %c0_26] : memref<64x128xf32, #tpu.memory_space<vmem>>, vector<1x128xf32>
    %123 = vector.shape_cast %122 : vector<1x128xf32> to vector<128xf32>
    %c13 = arith.constant 13 : index
    %c0_27 = arith.constant 0 : index
    %124 = vector.load %arg3[%c13, %c0_27] : memref<16x128xf32, #tpu.memory_space<vmem>>, vector<1x128xf32>
    %125 = vector.shape_cast %124 : vector<1x128xf32> to vector<128xf32>
    %126 = vector.shape_cast %123 : vector<128xf32> to vector<1x128xf32>
    tpu.vector_store %arg3[%c13, %c0_27], %126 {strides = array<i32>} : memref<16x128xf32, #tpu.memory_space<vmem>>, vector<1x128xf32>,
    %c14_i32 = arith.constant 14 : i32
    %127 = arith.addi %0, %c14_i32 : i32
    %128 = arith.index_cast %127 : i32 to index
    %129 = memref.load %arg1[%128] : memref<16xi32, #tpu.memory_space<smem>>
    %130 = arith.index_cast %129 : i32 to index
    %c0_28 = arith.constant 0 : index
    %131 = vector.load %arg2[%130, %c0_28] : memref<64x128xf32, #tpu.memory_space<vmem>>, vector<1x128xf32>
    %132 = vector.shape_cast %131 : vector<1x128xf32> to vector<128xf32>
    %c14 = arith.constant 14 : index
    %c0_29 = arith.constant 0 : index
    %133 = vector.load %arg3[%c14, %c0_29] : memref<16x128xf32, #tpu.memory_space<vmem>>, vector<1x128xf32>
    %134 = vector.shape_cast %133 : vector<1x128xf32> to vector<128xf32>
    %135 = vector.shape_cast %132 : vector<128xf32> to vector<1x128xf32>
    tpu.vector_store %arg3[%c14, %c0_29], %135 {strides = array<i32>} : memref<16x128xf32, #tpu.memory_space<vmem>>, vector<1x128xf32>,
    %c15_i32 = arith.constant 15 : i32
    %136 = arith.addi %0, %c15_i32 : i32
    %137 = arith.index_cast %136 : i32 to index
    %138 = memref.load %arg1[%137] : memref<16xi32, #tpu.memory_space<smem>>
    %139 = arith.index_cast %138 : i32 to index
    %c0_30 = arith.constant 0 : index
    %140 = vector.load %arg2[%139, %c0_30] : memref<64x128xf32, #tpu.memory_space<vmem>>, vector<1x128xf32>
    %141 = vector.shape_cast %140 : vector<1x128xf32> to vector<128xf32>
    %c15 = arith.constant 15 : index
    %c0_31 = arith.constant 0 : index
    %142 = vector.load %arg3[%c15, %c0_31] : memref<16x128xf32, #tpu.memory_space<vmem>>, vector<1x128xf32>
    %143 = vector.shape_cast %142 : vector<1x128xf32> to vector<128xf32>
    %144 = vector.shape_cast %141 : vector<128xf32> to vector<1x128xf32>
    tpu.vector_store %arg3[%c15, %c0_31], %144 {strides = array<i32>} : memref<16x128xf32, #tpu.memory_space<vmem>>, vector<1x128xf32>,
    return
  }
  func.func @transform_0(%arg0: i32, %arg1: memref<16xi32, #tpu.memory_space<smem>>) -> (i32, i32) {
    %c0_i32 = arith.constant 0 : i32
    %c0_i32_0 = arith.constant 0 : i32
    %c0_i32_1 = arith.constant 0 : i32
    return %c0_i32, %c0_i32_0 : i32, i32
  }
  func.func @transform_1(%arg0: i32, %arg1: memref<16xi32, #tpu.memory_space<smem>>) -> (i32, i32) {
    %c0_i32 = arith.constant 0 : i32
    %c0_i32_0 = arith.constant 0 : i32
    return %arg0, %c0_i32 : i32, i32
  }
}

</mosaic_0001>

<bundles_post_ra>
// kernel: tpu_custom_call.1
= control target key start
LH: loop header
LB: loop body
LE: loop exit
PB: predicated region body
PF: predicated region fallthrough
CT: control target
= control target key end

     0   :  { %s295_s0 = inlined_call_operand.hbm [shape: s32[16], index: 0, kind: input, shape index: {}]   ;;  %s296_s1 = inlined_call_operand.hbm [shape: f32[64,128], index: 1, kind: input, shape index: {}]   ;;  %s297_s2 = inlined_call_operand.hbm [shape: f32[16,128], index: 2, kind: output, shape index: {}]  }
   0x1   :  { %s161_s11 = scalar_lea.hbm %s295_s0, 16 }
   0x2   :  { %p162_p0 = scmp.ne.s32.totalorder %s295_s0, %s161_s11  ;;  %p165_p1 = scmp.lt.u32.totalorder %s161_s11, %s295_s0 }
   0x4   :  { %p167_p2 = pnand %p165_p1, %p162_p0 }
   0x6   :  { %170 = shalt.err (!%p167_p2)  }
   0x7   :  { %s221_s16 = smov [#allocation3]  }
   0x8   :  { %8 = dma.hbm_to_smem %s295_s0, 16, %s221_s16, [#allocation2] }
   0x9   :  { %215 = dma.done.wait [#allocation2], 16 }
   0xa   :  { %216 = vsyncadd [#allocation2], 4294967280 }
   0xb   :  { %10 = sfence }
   0xc   :  { %11 = vsyncpa [#allocation5], 0 }
   0xd   :  { %12 = vsyncpa [#allocation6], 0  ;;  %s222_s19 = smov [#allocation4]   ;;  %s171_s23 = scalar_lea.hbm %s296_s1, 1024 }
   0xe   :  { %s18_s20 = sshll.u32 %s222_s19, 4  ;;  %p172_p3 = scmp.ne.s32.totalorder %s296_s1, %s171_s23  ;;  %s19_s20 = int_to_ptr.vmem [resolvable:$true] %s18_s20 }
   0xf   :  { %p175_p4 = scmp.lt.u32.totalorder %s171_s23, %s296_s1 }
  0x11   :  { %p177_p5 = pnand %p175_p4, %p172_p3 }
  0x13   :  { %180 = shalt.err (!%p177_p5)
}
  0x14   :  { %s181_s0 = scalar_lea.vmem %s19_s20, 1024  ;;  %p186_p7 = scmp.lt.s32.totalorder %s19_s20, %s19_s20 }
  0x15   :  { %p182_p6 = scmp.ne.s32.totalorder %s19_s20, %s181_s0  ;;  %p187_p8 = scmp.lt.s32.totalorder %s181_s0, %s181_s0 }
  0x17   :  { %p188_p9 = por %p187_p8, %p186_p7 }
  0x19   :  { %p189_p10 = pnand %p188_p9, %p182_p6 }
  0x1b   :  { %192 = shalt.err (!%p189_p10)
}
  0x1c   :  { %s223_s28 = smov 128   ;;  %s224_s29 = smov 8  }
  0x1d   :  { %24 = dma.hbm_to_vmem [thread:$0]  %s296_s1, 1024, %s19_s20, [#allocation5], %s223_s28, %s223_s28, %s224_s29  }
  0x1e   :  { %217 = dma.done.wait [#allocation5], 1024  }
  0x1f   :  { %218 = vsyncadd [#allocation5], 4294966272  ;;  %s29_s4 = sld [smem:[#allocation3]]  ;;  %s141_s5 = sld [smem:[#allocation3 + $0x1]] }
  0x20   :  { %s142_s6 = sld [smem:[#allocation3 + $0x2]]  ;;  %s143_s7 = sld [smem:[#allocation3 + $0x3]] }
  0x21   :  { %s144_s8 = sld [smem:[#allocation3 + $0x4]]  ;;  %s145_s9 = sld [smem:[#allocation3 + $0x5]] }
  0x22   :  { %s146_s10 = sld [smem:[#allocation3 + $0x6]]  ;;  %s147_s11 = sld [smem:[#allocation3 + $0x7]] }
  0x23   :  { %s268_s12 = sld [smem:[#allocation3 + $0x8]]  ;;  %s270_s13 = sld [smem:[#allocation3 + $0x9]] }
  0x24   :  { %s272_s14 = sld [smem:[#allocation3 + $0xa]]  ;;  %s274_s15 = sld [smem:[#allocation3 + $0xb]] }
  0x25   :  { %s30_s16 = scalar_lea.vmem [#allocation4], %s29_s4  ;;  %s35_s1 = scalar_lea.vmem [#allocation4], %s141_s5 }
  0x26   :  { %v31_v0 = vld [vmem:[%s30_s16] sm:$0x1]  ;;  %s40_s17 = scalar_lea.vmem [#allocation4], %s142_s6  ;;  %s45_s18 = scalar_lea.vmem [#allocation4], %s143_s7 }
  0x27   :  { %v36_v1 = vld [vmem:[%s35_s1] sm:$0x1]  ;;  %32 = vst [vmem:[#allocation7] sm:$0x1] %v31_v0  ;;  %s50_s19 = scalar_lea.vmem [#allocation4], %s144_s8  ;;  %s55_s20 = scalar_lea.vmem [#allocation4], %s145_s9 }
  0x28   :  { %37 = vst [vmem:[#allocation7 + $0x1] sm:$0x1] %v36_v1  ;;  %v41_v2 = vld [vmem:[%s40_s17] sm:$0x1]  ;;  %s60_s21 = scalar_lea.vmem [#allocation4], %s146_s10  ;;  %s65_s22 = scalar_lea.vmem [#allocation4], %s147_s11 }
  0x29   :  { %v46_v3 = vld [vmem:[%s45_s18] sm:$0x1]  ;;  %42 = vst [vmem:[#allocation7 + $0x2] sm:$0x1] %v41_v2  ;;  %s70_s23 = scalar_lea.vmem [#allocation4], %s268_s12  ;;  %s75_s24 = scalar_lea.vmem [#allocation4], %s270_s13 }
  0x2a   :  { %47 = vst [vmem:[#allocation7 + $0x3] sm:$0x1] %v46_v3  ;;  %v51_v4 = vld [vmem:[%s50_s19] sm:$0x1]  ;;  %s80_s25 = scalar_lea.vmem [#allocation4], %s272_s14  ;;  %s85_s26 = scalar_lea.vmem [#allocation4], %s274_s15 }
  0x2b   :  { %v56_v5 = vld [vmem:[%s55_s20] sm:$0x1]  ;;  %52 = vst [vmem:[#allocation7 + $0x4] sm:$0x1] %v51_v4  ;;  %s152_s27 = sld [smem:[#allocation3 + $0xc]]  ;;  %s153_s0 = sld [smem:[#allocation3 + $0xd]] }
  0x2c   :  { %57 = vst [vmem:[#allocation7 + $0x5] sm:$0x1] %v56_v5  ;;  %v61_v6 = vld [vmem:[%s60_s21] sm:$0x1]  ;;  %s154_s30 = sld [smem:[#allocation3 + $0xe]]  ;;  %s155_s3 = sld [smem:[#allocation3 + $0xf]] }
  0x2d   :  { %v66_v7 = vld [vmem:[%s65_s22] sm:$0x1]  ;;  %62 = vst [vmem:[#allocation7 + $0x6] sm:$0x1] %v61_v6  ;;  %s225_s4 = smov [#allocation7]  }
  0x2e   :  { %67 = vst [vmem:[#allocation7 + $0x7] sm:$0x1] %v66_v7  ;;  %v71_v8 = vld [vmem:[%s70_s23] sm:$0x1]  ;;  %s113_s5 = sshll.u32 %s225_s4, 4  ;;  %s114_s5 = int_to_ptr.vmem [resolvable:$true] %s113_s5 }
  0x2f   :  { %v76_v9 = vld [vmem:[%s75_s24] sm:$0x1]  ;;  %72 = vst [vmem:[#allocation7 + $0x8] sm:$0x1] %v71_v8  ;;  %s193_s10 = scalar_lea.vmem %s114_s5, 256  ;;  %p198_p12 = scmp.lt.s32.totalorder %s114_s5, %s114_s5 }
  0x30   :  { %77 = vst [vmem:[#allocation7 + $0x9] sm:$0x1] %v76_v9  ;;  %v81_v10 = vld [vmem:[%s80_s25] sm:$0x1]  ;;  %p194_p11 = scmp.ne.s32.totalorder %s114_s5, %s193_s10  ;;  %p199_p13 = scmp.lt.s32.totalorder %s193_s10, %s193_s10 }
  0x31   :  { %v86_v11 = vld [vmem:[%s85_s26] sm:$0x1]  ;;  %82 = vst [vmem:[#allocation7 + $0xa] sm:$0x1] %v81_v10  ;;  %s90_s6 = scalar_lea.vmem [#allocation4], %s152_s27  ;;  %s95_s7 = scalar_lea.vmem [#allocation4], %s153_s0 }
  0x32   :  { %87 = vst [vmem:[#allocation7 + $0xb] sm:$0x1] %v86_v11  ;;  %v91_v12 = vld [vmem:[%s90_s6] sm:$0x1]  ;;  %s100_s8 = scalar_lea.vmem [#allocation4], %s154_s30  ;;  %s105_s9 = scalar_lea.vmem [#allocation4], %s155_s3 }
  0x33   :  { %92 = vst [vmem:[#allocation7 + $0xc] sm:$0x1] %v91_v12  ;;  %v96_v13 = vld [vmem:[%s95_s7] sm:$0x1]  ;;  %p200_p0 = por %p199_p13, %p198_p12 }
  0x34   :  { %v101_v14 = vld [vmem:[%s100_s8] sm:$0x1]  ;;  %97 = vst [vmem:[#allocation7 + $0xd] sm:$0x1] %v96_v13 }
  0x35   :  { %102 = vst [vmem:[#allocation7 + $0xe] sm:$0x1] %v101_v14  ;;  %v106_v15 = vld [vmem:[%s105_s9] sm:$0x1]  ;;  %p201_p1 = pnand %p200_p0, %p194_p11 }
  0x36   :  { %107 = vst [vmem:[#allocation7 + $0xf] sm:$0x1] %v106_v15 }
  0x37   :  { %204 = shalt.err (!%p201_p1)
}
  0x38   :  { %s205_s13 = scalar_lea.hbm %s297_s2, 256 }
  0x39   :  { %p206_p2 = scmp.ne.s32.totalorder %s297_s2, %s205_s13  ;;  %p209_p3 = scmp.lt.u32.totalorder %s205_s13, %s297_s2 }
  0x3b   :  { %p211_p4 = pnand %p209_p3, %p206_p2 }
  0x3d   :  { %214 = shalt.err (!%p211_p4)
}
  0x3e   :  { %119 = dma.vmem_to_hbm [thread:$0]  %s114_s5, 256, %s297_s2, [#allocation6], %s223_s28, %s223_s28, %s224_s29  }
  0x3f   :  { %219 = dma.done.wait [#allocation6], 256  }
  0x40   :  { %220 = vsyncadd [#allocation6], 4294967040 }
  0x41   :  { %123 = vsyncpa [#allocation5], 1 }
  0x42   :  { %124 = vsyncpa [#allocation6], 1 }

</bundles_post_ra>
